<compile_context>
chip_gen: v7x
topology: tpu7x:2x2x1
jax: 0.10.0
libtpu: 0.0.40
codegen_flags: <defaults>
</compile_context>

<pallas_src>
import math
import functools

import jax
import jax.numpy as jnp
from jax.experimental import pallas as pl
from jax.experimental.pallas import tpu as pltpu


def _encoder_layer_kernel(
    x_ref,                      # (rows, E)  rows = batch_block * L, batch-contiguous
    wqkvT_ref, bqkv_ref,        # (E, 3E), (1, 3E)
    woT_ref, bo_ref,            # (E, E),  (1, E)
    w1T_ref, b1_ref,            # (E, F),  (1, F)
    w2T_ref, b2_ref,            # (F, E),  (1, E)
    o_ref,                      # (rows, E)
    attn_scratch,               # VMEM (rows, E) f32
    *,
    nhead: int,
    head_dim: int,
    batch_block: int,
    seq_len: int,
):
    E = nhead * head_dim
    x = x_ref[...]  # (rows, E) f32

    # --- fused in-projection: one matmul for q, k and v ---
    qkv = jnp.dot(x, wqkvT_ref[...], preferred_element_type=jnp.float32) + bqkv_ref[...]
    # layout: qkv[:, 0:E] = q, qkv[:, E:2E] = k, qkv[:, 2E:3E] = v

    scale = 1.0 / math.sqrt(head_dim)
    # contract last dims of q_h and k_h directly (no materialized transpose)
    dn = (((1,), (1,)), ((), ()))

    # --- attention: static loop over (batch-in-block, head); the head output is
    # folded straight into the output projection (no concat of narrow slabs) ---
    for n in range(batch_block):
        r0 = n * seq_len
        r1 = r0 + seq_len
        acc = jnp.zeros((seq_len, E), jnp.float32)
        for h in range(nhead):
            lo = h * head_dim
            hi = lo + head_dim
            qh = qkv[r0:r1, lo:hi]               # (L, hd)
            kh = qkv[r0:r1, E + lo:E + hi]       # (L, hd)
            vh = qkv[r0:r1, 2 * E + lo:2 * E + hi]

            s = jax.lax.dot_general(qh, kh, dn,
                                    preferred_element_type=jnp.float32) * scale  # (L, L)
            s = s - jnp.max(s, axis=-1, keepdims=True)
            p = jnp.exp(s)
            p = p * pl.reciprocal(jnp.sum(p, axis=-1, keepdims=True), approx=True)
            oh = jnp.dot(p, vh, preferred_element_type=jnp.float32)              # (L, hd)
            # fold head h into the output projection
            acc = acc + jnp.dot(oh, woT_ref[lo:hi, :],
                                preferred_element_type=jnp.float32)              # (L, E)
        attn_scratch[r0:r1, :] = acc

    attn = attn_scratch[...] + bo_ref[...]

    # --- residual 1 (dropout1 is identity, p=0) ---
    x1 = x + attn

    # --- feed-forward; LeakyReLU(negative_slope=1.0) is the identity, so it is dropped ---
    h1 = jnp.dot(x1, w1T_ref[...], preferred_element_type=jnp.float32) + b1_ref[...]
    ff = jnp.dot(h1, w2T_ref[...], preferred_element_type=jnp.float32) + b2_ref[...]

    # --- residual 2 (dropout2 is identity, p=0) ---
    o_ref[...] = (x1 + ff).astype(o_ref.dtype)


def transformer_encoder_layer(src, params, *, nhead: int, batch_block: int | None = None):
    """src: (L, N, E) float32 -> (L, N, E) float32 (PyTorch layout)."""
    L, N, E = src.shape
    head_dim = E // nhead
    F = params["w1"].shape[0]

    if batch_block is None:
        # Batch several sequences per grid step so every matmul sees M = batch_block*L
        # rows; at large N pick batch_block so the grid still has several parallel
        # steps (feeds both TensorCores on v7x).
        batch_block = max(1, min(N, 8))
    n_pad = (-N) % batch_block
    Np = N + n_pad
    rows = batch_block * L

    # Pre-arranged weights: fused QKV (E, 3E) so the kernel does one x @ W matmul.
    wqkvT = params["in_proj_w"].T                    # (E, 3E)
    bqkv = params["in_proj_b"].reshape(1, 3 * E)
    woT = params["out_proj_w"].T                     # (E, E)
    bo = params["out_proj_b"].reshape(1, E)
    w1T = params["w1"].T                             # (E, F)
    b1 = params["b1"].reshape(1, F)
    w2T = params["w2"].T                             # (F, E)
    b2 = params["b2"].reshape(1, E)

    # (L, N, E) -> (N, L, E) -> (Np*L, E): batch-contiguous rows so attention slabs
    # are static row ranges and all row-wise matmuls are batched over the block.
    x = jnp.transpose(src, (1, 0, 2))
    if n_pad:
        x = jnp.concatenate([x, jnp.zeros((n_pad, L, E), x.dtype)], axis=0)
    x2d = x.reshape(Np * L, E)

    full = lambda shape: pl.BlockSpec(shape, lambda b: (0,) * len(shape))

    kernel = functools.partial(
        _encoder_layer_kernel,
        nhead=nhead, head_dim=head_dim, batch_block=batch_block, seq_len=L,
    )

    out2d = pl.pallas_call(
        kernel,
        out_shape=jax.ShapeDtypeStruct((Np * L, E), src.dtype),
        grid=(Np // batch_block,),
        in_specs=[
            pl.BlockSpec((rows, E), lambda b: (b, 0)),   # x: batch_block sequences
            full((E, 3 * E)), full((1, 3 * E)),          # fused Wqkv^T, bqkv
            full((E, E)), full((1, E)),                  # Wo^T, bo
            full((E, F)), full((1, F)),                  # W1^T, b1
            full((F, E)), full((1, E)),                  # W2^T, b2
        ],
        out_specs=pl.BlockSpec((rows, E), lambda b: (b, 0)),
        scratch_shapes=[pltpu.VMEM((rows, E), jnp.float32)],
        compiler_params=pltpu.CompilerParams(
            dimension_semantics=("parallel",)),
    )(x2d, wqkvT, bqkv, woT, bo, w1T, b1, w2T, b2)

    out = out2d.reshape(Np, L, E)[:N]                   # drop batch padding
    return jnp.transpose(out, (1, 0, 2))                # back to (L, N, E)


def _reference(src, params, *, nhead: int):
    """Pure-JAX reference replicating nn.MultiheadAttention + FFN (dropout=0)."""
    L, N, E = src.shape
    hd = E // nhead
    x = src.astype(jnp.float32)
    qkv_w, qkv_b = params["in_proj_w"], params["in_proj_b"]
    q = x @ qkv_w[:E].T + qkv_b[:E]
    k = x @ qkv_w[E:2 * E].T + qkv_b[E:2 * E]
    v = x @ qkv_w[2 * E:].T + qkv_b[2 * E:]

    def split(t):  # (L, N, E) -> (N, H, L, hd)
        return jnp.transpose(t.reshape(L, N, nhead, hd), (1, 2, 0, 3))

    qh, kh, vh = split(q), split(k), split(v)
    s = jnp.einsum("bhld,bhmd->bhlm", qh, kh) / math.sqrt(hd)
    p = jax.nn.softmax(s, axis=-1)
    o = jnp.einsum("bhlm,bhmd->bhld", p, vh)            # (N, H, L, hd)
    o = jnp.transpose(o, (2, 0, 1, 3)).reshape(L, N, E)
    attn = o @ params["out_proj_w"].T + params["out_proj_b"]
    x1 = x + attn
    h1 = x1 @ params["w1"].T + params["b1"]             # LeakyReLU slope 1.0 = identity
    ff = h1 @ params["w2"].T + params["b2"]
    return x1 + ff


if __name__ == "__main__":
    # Small shapes consistent with the module: seq=8, batch=2, d_model=32,
    # nhead=4, dim_feedforward=16.
    L, N, E, H, F = 8, 2, 32, 4, 16

    key = jax.random.PRNGKey(0)
    ks = jax.random.split(key, 9)
    scale = 0.1
    params = {
        "in_proj_w": scale * jax.random.normal(ks[0], (3 * E, E), jnp.float32),
        "in_proj_b": scale * jax.random.normal(ks[1], (3 * E,), jnp.float32),
        "out_proj_w": scale * jax.random.normal(ks[2], (E, E), jnp.float32),
        "out_proj_b": scale * jax.random.normal(ks[3], (E,), jnp.float32),
        "w1": scale * jax.random.normal(ks[4], (F, E), jnp.float32),
        "b1": scale * jax.random.normal(ks[5], (F,), jnp.float32),
        "w2": scale * jax.random.normal(ks[6], (E, F), jnp.float32),
        "b2": scale * jax.random.normal(ks[7], (E,), jnp.float32),
    }
    src = jax.random.normal(ks[8], (L, N, E), jnp.float32)

    out = transformer_encoder_layer(src, params, nhead=H)
    out = jax.block_until_ready(out)

    ref = _reference(src, params, nhead=H)
    assert out.shape == (L, N, E)
    # 1e-3 tolerance: f32 matmuls with f32 accumulation; the only approximate step
    # is the EUP reciprocal in the softmax denominator (error well below this bound).
    assert jnp.allclose(out, ref, atol=1e-3, rtol=1e-3), "mismatch vs reference"

    print("KERNEL_OK")
</pallas_src>

<mosaic_0001>
module attributes {stable_mosaic.version = 11 : i64} {
  func.func @_encoder_layer_kernel(%arg0: i32, %arg1: memref<16x32xf32, #tpu.memory_space<vmem>>, %arg2: memref<32x96xf32, #tpu.memory_space<vmem>>, %arg3: memref<1x96xf32, #tpu.memory_space<vmem>>, %arg4: memref<32x32xf32, #tpu.memory_space<vmem>>, %arg5: memref<1x32xf32, #tpu.memory_space<vmem>>, %arg6: memref<32x16xf32, #tpu.memory_space<vmem>>, %arg7: memref<1x16xf32, #tpu.memory_space<vmem>>, %arg8: memref<16x32xf32, #tpu.memory_space<vmem>>, %arg9: memref<1x32xf32, #tpu.memory_space<vmem>>, %arg10: memref<16x32xf32, #tpu.memory_space<vmem>>, %arg11: memref<16x32xf32, #tpu.memory_space<vmem>>) attributes {dimension_semantics = [#tpu.dimension_semantics<parallel>], iteration_bounds = array<i64: 1>, scalar_prefetch = 0 : i64, scratch_operands = 1 : i64, tpu.core_type = #tpu.core_type<tc>, window_params = [{transform_indices = @transform_0, window_bounds = array<i64: 16, 32>}, {pipeline_mode = #tpu.pipeline_mode<synchronous>, transform_indices = @transform_1, window_bounds = array<i64: 32, 96>}, {pipeline_mode = #tpu.pipeline_mode<synchronous>, transform_indices = @transform_2, window_bounds = array<i64: 1, 96>}, {pipeline_mode = #tpu.pipeline_mode<synchronous>, transform_indices = @transform_3, window_bounds = array<i64: 32, 32>}, {pipeline_mode = #tpu.pipeline_mode<synchronous>, transform_indices = @transform_4, window_bounds = array<i64: 1, 32>}, {pipeline_mode = #tpu.pipeline_mode<synchronous>, transform_indices = @transform_5, window_bounds = array<i64: 32, 16>}, {pipeline_mode = #tpu.pipeline_mode<synchronous>, transform_indices = @transform_6, window_bounds = array<i64: 1, 16>}, {pipeline_mode = #tpu.pipeline_mode<synchronous>, transform_indices = @transform_7, window_bounds = array<i64: 16, 32>}, {pipeline_mode = #tpu.pipeline_mode<synchronous>, transform_indices = @transform_8, window_bounds = array<i64: 1, 32>}, {transform_indices = @transform_9, window_bounds = array<i64: 16, 32>}]} {
    %c0 = arith.constant 0 : index
    %c0_0 = arith.constant 0 : index
    %0 = vector.load %arg1[%c0, %c0_0] : memref<16x32xf32, #tpu.memory_space<vmem>>, vector<16x32xf32>
    %c0_1 = arith.constant 0 : index
    %c0_2 = arith.constant 0 : index
    %1 = vector.load %arg2[%c0_1, %c0_2] : memref<32x96xf32, #tpu.memory_space<vmem>>, vector<32x96xf32>
    %cst = arith.constant dense<0.000000e+00> : vector<16x96xf32>
    %2 = tpu.matmul %0, %1, %cst {dimension_numbers = #tpu.dot_dimension_numbers<[1], [0], [0], [1], [0, 0, 1, 1], [], []>} : vector<16x32xf32>, vector<32x96xf32>, vector<16x96xf32> -> vector<16x96xf32>
    %c0_3 = arith.constant 0 : index
    %c0_4 = arith.constant 0 : index
    %3 = vector.load %arg3[%c0_3, %c0_4] : memref<1x96xf32, #tpu.memory_space<vmem>>, vector<1x96xf32>
    %4 = vector.broadcast %3 : vector<1x96xf32> to vector<16x96xf32>
    %5 = arith.addf %2, %4 : vector<16x96xf32>
    %cst_5 = arith.constant 0.000000e+00 : f32
    %6 = vector.broadcast %cst_5 : f32 to vector<8x32xf32>
    %7 = vector.extract_strided_slice %5 {offsets = [0, 0], sizes = [8, 8], strides = [1, 1]} : vector<16x96xf32> to vector<8x8xf32>
    %8 = vector.extract_strided_slice %5 {offsets = [0, 32], sizes = [8, 8], strides = [1, 1]} : vector<16x96xf32> to vector<8x8xf32>
    %9 = vector.extract_strided_slice %5 {offsets = [0, 64], sizes = [8, 8], strides = [1, 1]} : vector<16x96xf32> to vector<8x8xf32>
    %cst_6 = arith.constant dense<0.000000e+00> : vector<8x8xf32>
    %10 = tpu.matmul %7, %8, %cst_6 {dimension_numbers = #tpu.dot_dimension_numbers<[1], [1], [0], [0], [0, 0, 1, 0], [], []>} : vector<8x8xf32>, vector<8x8xf32>, vector<8x8xf32> -> vector<8x8xf32>
    %cst_7 = arith.constant 0.353553385 : f32
    %11 = vector.broadcast %cst_7 : f32 to vector<8x8xf32>
    %12 = arith.mulf %10, %11 : vector<8x8xf32>
    %cst_8 = arith.constant dense<0xFF800000> : vector<8xf32>
    %13 = vector.multi_reduction <maximumf>, %12, %cst_8 [1] : vector<8x8xf32> to vector<8xf32>
    %14 = vector.shape_cast %13 : vector<8xf32> to vector<8x1xf32>
    %15 = vector.broadcast %14 : vector<8x1xf32> to vector<8x8xf32>
    %16 = arith.subf %12, %15 : vector<8x8xf32>
    %17 = math.exp %16 : vector<8x8xf32>
    %cst_9 = arith.constant dense<0.000000e+00> : vector<8xf32>
    %18 = vector.multi_reduction <add>, %17, %cst_9 [1] : vector<8x8xf32> to vector<8xf32>
    %19 = vector.shape_cast %18 : vector<8xf32> to vector<8x1xf32>
    %20 = tpu.reciprocal %19 {approx = true} : vector<8x1xf32> -> vector<8x1xf32>
    %21 = vector.broadcast %20 : vector<8x1xf32> to vector<8x8xf32>
    %22 = arith.mulf %17, %21 : vector<8x8xf32>
    %cst_10 = arith.constant dense<0.000000e+00> : vector<8x8xf32>
    %23 = tpu.matmul %22, %9, %cst_10 {dimension_numbers = #tpu.dot_dimension_numbers<[1], [0], [0], [1], [0, 0, 1, 1], [], []>} : vector<8x8xf32>, vector<8x8xf32>, vector<8x8xf32> -> vector<8x8xf32>
    %c0_11 = arith.constant 0 : index
    %c0_12 = arith.constant 0 : index
    %24 = vector.load %arg4[%c0_11, %c0_12] : memref<32x32xf32, #tpu.memory_space<vmem>>, vector<8x32xf32>
    %cst_13 = arith.constant dense<0.000000e+00> : vector<8x32xf32>
    %25 = tpu.matmul %23, %24, %cst_13 {dimension_numbers = #tpu.dot_dimension_numbers<[1], [0], [0], [1], [0, 0, 1, 1], [], []>} : vector<8x8xf32>, vector<8x32xf32>, vector<8x32xf32> -> vector<8x32xf32>
    %26 = arith.addf %6, %25 : vector<8x32xf32>
    %27 = vector.extract_strided_slice %5 {offsets = [0, 8], sizes = [8, 8], strides = [1, 1]} : vector<16x96xf32> to vector<8x8xf32>
    %28 = vector.extract_strided_slice %5 {offsets = [0, 40], sizes = [8, 8], strides = [1, 1]} : vector<16x96xf32> to vector<8x8xf32>
    %29 = vector.extract_strided_slice %5 {offsets = [0, 72], sizes = [8, 8], strides = [1, 1]} : vector<16x96xf32> to vector<8x8xf32>
    %cst_14 = arith.constant dense<0.000000e+00> : vector<8x8xf32>
    %30 = tpu.matmul %27, %28, %cst_14 {dimension_numbers = #tpu.dot_dimension_numbers<[1], [1], [0], [0], [0, 0, 1, 0], [], []>} : vector<8x8xf32>, vector<8x8xf32>, vector<8x8xf32> -> vector<8x8xf32>
    %cst_15 = arith.constant 0.353553385 : f32
    %31 = vector.broadcast %cst_15 : f32 to vector<8x8xf32>
    %32 = arith.mulf %30, %31 : vector<8x8xf32>
    %cst_16 = arith.constant dense<0xFF800000> : vector<8xf32>
    %33 = vector.multi_reduction <maximumf>, %32, %cst_16 [1] : vector<8x8xf32> to vector<8xf32>
    %34 = vector.shape_cast %33 : vector<8xf32> to vector<8x1xf32>
    %35 = vector.broadcast %34 : vector<8x1xf32> to vector<8x8xf32>
    %36 = arith.subf %32, %35 : vector<8x8xf32>
    %37 = math.exp %36 : vector<8x8xf32>
    %cst_17 = arith.constant dense<0.000000e+00> : vector<8xf32>
    %38 = vector.multi_reduction <add>, %37, %cst_17 [1] : vector<8x8xf32> to vector<8xf32>
    %39 = vector.shape_cast %38 : vector<8xf32> to vector<8x1xf32>
    %40 = tpu.reciprocal %39 {approx = true} : vector<8x1xf32> -> vector<8x1xf32>
    %41 = vector.broadcast %40 : vector<8x1xf32> to vector<8x8xf32>
    %42 = arith.mulf %37, %41 : vector<8x8xf32>
    %cst_18 = arith.constant dense<0.000000e+00> : vector<8x8xf32>
    %43 = tpu.matmul %42, %29, %cst_18 {dimension_numbers = #tpu.dot_dimension_numbers<[1], [0], [0], [1], [0, 0, 1, 1], [], []>} : vector<8x8xf32>, vector<8x8xf32>, vector<8x8xf32> -> vector<8x8xf32>
    %c8 = arith.constant 8 : index
    %c0_19 = arith.constant 0 : index
    %44 = vector.load %arg4[%c8, %c0_19] : memref<32x32xf32, #tpu.memory_space<vmem>>, vector<8x32xf32>
    %cst_20 = arith.constant dense<0.000000e+00> : vector<8x32xf32>
    %45 = tpu.matmul %43, %44, %cst_20 {dimension_numbers = #tpu.dot_dimension_numbers<[1], [0], [0], [1], [0, 0, 1, 1], [], []>} : vector<8x8xf32>, vector<8x32xf32>, vector<8x32xf32> -> vector<8x32xf32>
    %46 = arith.addf %26, %45 : vector<8x32xf32>
    %47 = vector.extract_strided_slice %5 {offsets = [0, 16], sizes = [8, 8], strides = [1, 1]} : vector<16x96xf32> to vector<8x8xf32>
    %48 = vector.extract_strided_slice %5 {offsets = [0, 48], sizes = [8, 8], strides = [1, 1]} : vector<16x96xf32> to vector<8x8xf32>
    %49 = vector.extract_strided_slice %5 {offsets = [0, 80], sizes = [8, 8], strides = [1, 1]} : vector<16x96xf32> to vector<8x8xf32>
    %cst_21 = arith.constant dense<0.000000e+00> : vector<8x8xf32>
    %50 = tpu.matmul %47, %48, %cst_21 {dimension_numbers = #tpu.dot_dimension_numbers<[1], [1], [0], [0], [0, 0, 1, 0], [], []>} : vector<8x8xf32>, vector<8x8xf32>, vector<8x8xf32> -> vector<8x8xf32>
    %cst_22 = arith.constant 0.353553385 : f32
    %51 = vector.broadcast %cst_22 : f32 to vector<8x8xf32>
    %52 = arith.mulf %50, %51 : vector<8x8xf32>
    %cst_23 = arith.constant dense<0xFF800000> : vector<8xf32>
    %53 = vector.multi_reduction <maximumf>, %52, %cst_23 [1] : vector<8x8xf32> to vector<8xf32>
    %54 = vector.shape_cast %53 : vector<8xf32> to vector<8x1xf32>
    %55 = vector.broadcast %54 : vector<8x1xf32> to vector<8x8xf32>
    %56 = arith.subf %52, %55 : vector<8x8xf32>
    %57 = math.exp %56 : vector<8x8xf32>
    %cst_24 = arith.constant dense<0.000000e+00> : vector<8xf32>
    %58 = vector.multi_reduction <add>, %57, %cst_24 [1] : vector<8x8xf32> to vector<8xf32>
    %59 = vector.shape_cast %58 : vector<8xf32> to vector<8x1xf32>
    %60 = tpu.reciprocal %59 {approx = true} : vector<8x1xf32> -> vector<8x1xf32>
    %61 = vector.broadcast %60 : vector<8x1xf32> to vector<8x8xf32>
    %62 = arith.mulf %57, %61 : vector<8x8xf32>
    %cst_25 = arith.constant dense<0.000000e+00> : vector<8x8xf32>
    %63 = tpu.matmul %62, %49, %cst_25 {dimension_numbers = #tpu.dot_dimension_numbers<[1], [0], [0], [1], [0, 0, 1, 1], [], []>} : vector<8x8xf32>, vector<8x8xf32>, vector<8x8xf32> -> vector<8x8xf32>
    %c16 = arith.constant 16 : index
    %c0_26 = arith.constant 0 : index
    %64 = vector.load %arg4[%c16, %c0_26] : memref<32x32xf32, #tpu.memory_space<vmem>>, vector<8x32xf32>
    %cst_27 = arith.constant dense<0.000000e+00> : vector<8x32xf32>
    %65 = tpu.matmul %63, %64, %cst_27 {dimension_numbers = #tpu.dot_dimension_numbers<[1], [0], [0], [1], [0, 0, 1, 1], [], []>} : vector<8x8xf32>, vector<8x32xf32>, vector<8x32xf32> -> vector<8x32xf32>
    %66 = arith.addf %46, %65 : vector<8x32xf32>
    %67 = vector.extract_strided_slice %5 {offsets = [0, 24], sizes = [8, 8], strides = [1, 1]} : vector<16x96xf32> to vector<8x8xf32>
    %68 = vector.extract_strided_slice %5 {offsets = [0, 56], sizes = [8, 8], strides = [1, 1]} : vector<16x96xf32> to vector<8x8xf32>
    %69 = vector.extract_strided_slice %5 {offsets = [0, 88], sizes = [8, 8], strides = [1, 1]} : vector<16x96xf32> to vector<8x8xf32>
    %cst_28 = arith.constant dense<0.000000e+00> : vector<8x8xf32>
    %70 = tpu.matmul %67, %68, %cst_28 {dimension_numbers = #tpu.dot_dimension_numbers<[1], [1], [0], [0], [0, 0, 1, 0], [], []>} : vector<8x8xf32>, vector<8x8xf32>, vector<8x8xf32> -> vector<8x8xf32>
    %cst_29 = arith.constant 0.353553385 : f32
    %71 = vector.broadcast %cst_29 : f32 to vector<8x8xf32>
    %72 = arith.mulf %70, %71 : vector<8x8xf32>
    %cst_30 = arith.constant dense<0xFF800000> : vector<8xf32>
    %73 = vector.multi_reduction <maximumf>, %72, %cst_30 [1] : vector<8x8xf32> to vector<8xf32>
    %74 = vector.shape_cast %73 : vector<8xf32> to vector<8x1xf32>
    %75 = vector.broadcast %74 : vector<8x1xf32> to vector<8x8xf32>
    %76 = arith.subf %72, %75 : vector<8x8xf32>
    %77 = math.exp %76 : vector<8x8xf32>
    %cst_31 = arith.constant dense<0.000000e+00> : vector<8xf32>
    %78 = vector.multi_reduction <add>, %77, %cst_31 [1] : vector<8x8xf32> to vector<8xf32>
    %79 = vector.shape_cast %78 : vector<8xf32> to vector<8x1xf32>
    %80 = tpu.reciprocal %79 {approx = true} : vector<8x1xf32> -> vector<8x1xf32>
    %81 = vector.broadcast %80 : vector<8x1xf32> to vector<8x8xf32>
    %82 = arith.mulf %77, %81 : vector<8x8xf32>
    %cst_32 = arith.constant dense<0.000000e+00> : vector<8x8xf32>
    %83 = tpu.matmul %82, %69, %cst_32 {dimension_numbers = #tpu.dot_dimension_numbers<[1], [0], [0], [1], [0, 0, 1, 1], [], []>} : vector<8x8xf32>, vector<8x8xf32>, vector<8x8xf32> -> vector<8x8xf32>
    %c24 = arith.constant 24 : index
    %c0_33 = arith.constant 0 : index
    %84 = vector.load %arg4[%c24, %c0_33] : memref<32x32xf32, #tpu.memory_space<vmem>>, vector<8x32xf32>
    %cst_34 = arith.constant dense<0.000000e+00> : vector<8x32xf32>
    %85 = tpu.matmul %83, %84, %cst_34 {dimension_numbers = #tpu.dot_dimension_numbers<[1], [0], [0], [1], [0, 0, 1, 1], [], []>} : vector<8x8xf32>, vector<8x32xf32>, vector<8x32xf32> -> vector<8x32xf32>
    %86 = arith.addf %66, %85 : vector<8x32xf32>
    %c0_35 = arith.constant 0 : index
    %c0_36 = arith.constant 0 : index
    %87 = vector.load %arg11[%c0_35, %c0_36] : memref<16x32xf32, #tpu.memory_space<vmem>>, vector<8x32xf32>
    tpu.vector_store %arg11[%c0_35, %c0_36], %86 {strides = array<i32>} : memref<16x32xf32, #tpu.memory_space<vmem>>, vector<8x32xf32>,
    %cst_37 = arith.constant 0.000000e+00 : f32
    %88 = vector.broadcast %cst_37 : f32 to vector<8x32xf32>
    %89 = vector.extract_strided_slice %5 {offsets = [8, 0], sizes = [8, 8], strides = [1, 1]} : vector<16x96xf32> to vector<8x8xf32>
    %90 = vector.extract_strided_slice %5 {offsets = [8, 32], sizes = [8, 8], strides = [1, 1]} : vector<16x96xf32> to vector<8x8xf32>
    %91 = vector.extract_strided_slice %5 {offsets = [8, 64], sizes = [8, 8], strides = [1, 1]} : vector<16x96xf32> to vector<8x8xf32>
    %cst_38 = arith.constant dense<0.000000e+00> : vector<8x8xf32>
    %92 = tpu.matmul %89, %90, %cst_38 {dimension_numbers = #tpu.dot_dimension_numbers<[1], [1], [0], [0], [0, 0, 1, 0], [], []>} : vector<8x8xf32>, vector<8x8xf32>, vector<8x8xf32> -> vector<8x8xf32>
    %cst_39 = arith.constant 0.353553385 : f32
    %93 = vector.broadcast %cst_39 : f32 to vector<8x8xf32>
    %94 = arith.mulf %92, %93 : vector<8x8xf32>
    %cst_40 = arith.constant dense<0xFF800000> : vector<8xf32>
    %95 = vector.multi_reduction <maximumf>, %94, %cst_40 [1] : vector<8x8xf32> to vector<8xf32>
    %96 = vector.shape_cast %95 : vector<8xf32> to vector<8x1xf32>
    %97 = vector.broadcast %96 : vector<8x1xf32> to vector<8x8xf32>
    %98 = arith.subf %94, %97 : vector<8x8xf32>
    %99 = math.exp %98 : vector<8x8xf32>
    %cst_41 = arith.constant dense<0.000000e+00> : vector<8xf32>
    %100 = vector.multi_reduction <add>, %99, %cst_41 [1] : vector<8x8xf32> to vector<8xf32>
    %101 = vector.shape_cast %100 : vector<8xf32> to vector<8x1xf32>
    %102 = tpu.reciprocal %101 {approx = true} : vector<8x1xf32> -> vector<8x1xf32>
    %103 = vector.broadcast %102 : vector<8x1xf32> to vector<8x8xf32>
    %104 = arith.mulf %99, %103 : vector<8x8xf32>
    %cst_42 = arith.constant dense<0.000000e+00> : vector<8x8xf32>
    %105 = tpu.matmul %104, %91, %cst_42 {dimension_numbers = #tpu.dot_dimension_numbers<[1], [0], [0], [1], [0, 0, 1, 1], [], []>} : vector<8x8xf32>, vector<8x8xf32>, vector<8x8xf32> -> vector<8x8xf32>
    %c0_43 = arith.constant 0 : index
    %c0_44 = arith.constant 0 : index
    %106 = vector.load %arg4[%c0_43, %c0_44] : memref<32x32xf32, #tpu.memory_space<vmem>>, vector<8x32xf32>
    %cst_45 = arith.constant dense<0.000000e+00> : vector<8x32xf32>
    %107 = tpu.matmul %105, %106, %cst_45 {dimension_numbers = #tpu.dot_dimension_numbers<[1], [0], [0], [1], [0, 0, 1, 1], [], []>} : vector<8x8xf32>, vector<8x32xf32>, vector<8x32xf32> -> vector<8x32xf32>
    %108 = arith.addf %88, %107 : vector<8x32xf32>
    %109 = vector.extract_strided_slice %5 {offsets = [8, 8], sizes = [8, 8], strides = [1, 1]} : vector<16x96xf32> to vector<8x8xf32>
    %110 = vector.extract_strided_slice %5 {offsets = [8, 40], sizes = [8, 8], strides = [1, 1]} : vector<16x96xf32> to vector<8x8xf32>
    %111 = vector.extract_strided_slice %5 {offsets = [8, 72], sizes = [8, 8], strides = [1, 1]} : vector<16x96xf32> to vector<8x8xf32>
    %cst_46 = arith.constant dense<0.000000e+00> : vector<8x8xf32>
    %112 = tpu.matmul %109, %110, %cst_46 {dimension_numbers = #tpu.dot_dimension_numbers<[1], [1], [0], [0], [0, 0, 1, 0], [], []>} : vector<8x8xf32>, vector<8x8xf32>, vector<8x8xf32> -> vector<8x8xf32>
    %cst_47 = arith.constant 0.353553385 : f32
    %113 = vector.broadcast %cst_47 : f32 to vector<8x8xf32>
    %114 = arith.mulf %112, %113 : vector<8x8xf32>
    %cst_48 = arith.constant dense<0xFF800000> : vector<8xf32>
    %115 = vector.multi_reduction <maximumf>, %114, %cst_48 [1] : vector<8x8xf32> to vector<8xf32>
    %116 = vector.shape_cast %115 : vector<8xf32> to vector<8x1xf32>
    %117 = vector.broadcast %116 : vector<8x1xf32> to vector<8x8xf32>
    %118 = arith.subf %114, %117 : vector<8x8xf32>
    %119 = math.exp %118 : vector<8x8xf32>
    %cst_49 = arith.constant dense<0.000000e+00> : vector<8xf32>
    %120 = vector.multi_reduction <add>, %119, %cst_49 [1] : vector<8x8xf32> to vector<8xf32>
    %121 = vector.shape_cast %120 : vector<8xf32> to vector<8x1xf32>
    %122 = tpu.reciprocal %121 {approx = true} : vector<8x1xf32> -> vector<8x1xf32>
    %123 = vector.broadcast %122 : vector<8x1xf32> to vector<8x8xf32>
    %124 = arith.mulf %119, %123 : vector<8x8xf32>
    %cst_50 = arith.constant dense<0.000000e+00> : vector<8x8xf32>
    %125 = tpu.matmul %124, %111, %cst_50 {dimension_numbers = #tpu.dot_dimension_numbers<[1], [0], [0], [1], [0, 0, 1, 1], [], []>} : vector<8x8xf32>, vector<8x8xf32>, vector<8x8xf32> -> vector<8x8xf32>
    %c8_51 = arith.constant 8 : index
    %c0_52 = arith.constant 0 : index
    %126 = vector.load %arg4[%c8_51, %c0_52] : memref<32x32xf32, #tpu.memory_space<vmem>>, vector<8x32xf32>
    %cst_53 = arith.constant dense<0.000000e+00> : vector<8x32xf32>
    %127 = tpu.matmul %125, %126, %cst_53 {dimension_numbers = #tpu.dot_dimension_numbers<[1], [0], [0], [1], [0, 0, 1, 1], [], []>} : vector<8x8xf32>, vector<8x32xf32>, vector<8x32xf32> -> vector<8x32xf32>
    %128 = arith.addf %108, %127 : vector<8x32xf32>
    %129 = vector.extract_strided_slice %5 {offsets = [8, 16], sizes = [8, 8], strides = [1, 1]} : vector<16x96xf32> to vector<8x8xf32>
    %130 = vector.extract_strided_slice %5 {offsets = [8, 48], sizes = [8, 8], strides = [1, 1]} : vector<16x96xf32> to vector<8x8xf32>
    %131 = vector.extract_strided_slice %5 {offsets = [8, 80], sizes = [8, 8], strides = [1, 1]} : vector<16x96xf32> to vector<8x8xf32>
    %cst_54 = arith.constant dense<0.000000e+00> : vector<8x8xf32>
    %132 = tpu.matmul %129, %130, %cst_54 {dimension_numbers = #tpu.dot_dimension_numbers<[1], [1], [0], [0], [0, 0, 1, 0], [], []>} : vector<8x8xf32>, vector<8x8xf32>, vector<8x8xf32> -> vector<8x8xf32>
    %cst_55 = arith.constant 0.353553385 : f32
    %133 = vector.broadcast %cst_55 : f32 to vector<8x8xf32>
    %134 = arith.mulf %132, %133 : vector<8x8xf32>
    %cst_56 = arith.constant dense<0xFF800000> : vector<8xf32>
    %135 = vector.multi_reduction <maximumf>, %134, %cst_56 [1] : vector<8x8xf32> to vector<8xf32>
    %136 = vector.shape_cast %135 : vector<8xf32> to vector<8x1xf32>
    %137 = vector.broadcast %136 : vector<8x1xf32> to vector<8x8xf32>
    %138 = arith.subf %134, %137 : vector<8x8xf32>
    %139 = math.exp %138 : vector<8x8xf32>
    %cst_57 = arith.constant dense<0.000000e+00> : vector<8xf32>
    %140 = vector.multi_reduction <add>, %139, %cst_57 [1] : vector<8x8xf32> to vector<8xf32>
    %141 = vector.shape_cast %140 : vector<8xf32> to vector<8x1xf32>
    %142 = tpu.reciprocal %141 {approx = true} : vector<8x1xf32> -> vector<8x1xf32>
    %143 = vector.broadcast %142 : vector<8x1xf32> to vector<8x8xf32>
    %144 = arith.mulf %139, %143 : vector<8x8xf32>
    %cst_58 = arith.constant dense<0.000000e+00> : vector<8x8xf32>
    %145 = tpu.matmul %144, %131, %cst_58 {dimension_numbers = #tpu.dot_dimension_numbers<[1], [0], [0], [1], [0, 0, 1, 1], [], []>} : vector<8x8xf32>, vector<8x8xf32>, vector<8x8xf32> -> vector<8x8xf32>
    %c16_59 = arith.constant 16 : index
    %c0_60 = arith.constant 0 : index
    %146 = vector.load %arg4[%c16_59, %c0_60] : memref<32x32xf32, #tpu.memory_space<vmem>>, vector<8x32xf32>
    %cst_61 = arith.constant dense<0.000000e+00> : vector<8x32xf32>
    %147 = tpu.matmul %145, %146, %cst_61 {dimension_numbers = #tpu.dot_dimension_numbers<[1], [0], [0], [1], [0, 0, 1, 1], [], []>} : vector<8x8xf32>, vector<8x32xf32>, vector<8x32xf32> -> vector<8x32xf32>
    %148 = arith.addf %128, %147 : vector<8x32xf32>
    %149 = vector.extract_strided_slice %5 {offsets = [8, 24], sizes = [8, 8], strides = [1, 1]} : vector<16x96xf32> to vector<8x8xf32>
    %150 = vector.extract_strided_slice %5 {offsets = [8, 56], sizes = [8, 8], strides = [1, 1]} : vector<16x96xf32> to vector<8x8xf32>
    %151 = vector.extract_strided_slice %5 {offsets = [8, 88], sizes = [8, 8], strides = [1, 1]} : vector<16x96xf32> to vector<8x8xf32>
    %cst_62 = arith.constant dense<0.000000e+00> : vector<8x8xf32>
    %152 = tpu.matmul %149, %150, %cst_62 {dimension_numbers = #tpu.dot_dimension_numbers<[1], [1], [0], [0], [0, 0, 1, 0], [], []>} : vector<8x8xf32>, vector<8x8xf32>, vector<8x8xf32> -> vector<8x8xf32>
    %cst_63 = arith.constant 0.353553385 : f32
    %153 = vector.broadcast %cst_63 : f32 to vector<8x8xf32>
    %154 = arith.mulf %152, %153 : vector<8x8xf32>
    %cst_64 = arith.constant dense<0xFF800000> : vector<8xf32>
    %155 = vector.multi_reduction <maximumf>, %154, %cst_64 [1] : vector<8x8xf32> to vector<8xf32>
    %156 = vector.shape_cast %155 : vector<8xf32> to vector<8x1xf32>
    %157 = vector.broadcast %156 : vector<8x1xf32> to vector<8x8xf32>
    %158 = arith.subf %154, %157 : vector<8x8xf32>
    %159 = math.exp %158 : vector<8x8xf32>
    %cst_65 = arith.constant dense<0.000000e+00> : vector<8xf32>
    %160 = vector.multi_reduction <add>, %159, %cst_65 [1] : vector<8x8xf32> to vector<8xf32>
    %161 = vector.shape_cast %160 : vector<8xf32> to vector<8x1xf32>
    %162 = tpu.reciprocal %161 {approx = true} : vector<8x1xf32> -> vector<8x1xf32>
    %163 = vector.broadcast %162 : vector<8x1xf32> to vector<8x8xf32>
    %164 = arith.mulf %159, %163 : vector<8x8xf32>
    %cst_66 = arith.constant dense<0.000000e+00> : vector<8x8xf32>
    %165 = tpu.matmul %164, %151, %cst_66 {dimension_numbers = #tpu.dot_dimension_numbers<[1], [0], [0], [1], [0, 0, 1, 1], [], []>} : vector<8x8xf32>, vector<8x8xf32>, vector<8x8xf32> -> vector<8x8xf32>
    %c24_67 = arith.constant 24 : index
    %c0_68 = arith.constant 0 : index
    %166 = vector.load %arg4[%c24_67, %c0_68] : memref<32x32xf32, #tpu.memory_space<vmem>>, vector<8x32xf32>
    %cst_69 = arith.constant dense<0.000000e+00> : vector<8x32xf32>
    %167 = tpu.matmul %165, %166, %cst_69 {dimension_numbers = #tpu.dot_dimension_numbers<[1], [0], [0], [1], [0, 0, 1, 1], [], []>} : vector<8x8xf32>, vector<8x32xf32>, vector<8x32xf32> -> vector<8x32xf32>
    %168 = arith.addf %148, %167 : vector<8x32xf32>
    %c8_70 = arith.constant 8 : index
    %c0_71 = arith.constant 0 : index
    %169 = vector.load %arg11[%c8_70, %c0_71] : memref<16x32xf32, #tpu.memory_space<vmem>>, vector<8x32xf32>
    tpu.vector_store %arg11[%c8_70, %c0_71], %168 {strides = array<i32>} : memref<16x32xf32, #tpu.memory_space<vmem>>, vector<8x32xf32>,
    %c0_72 = arith.constant 0 : index
    %c0_73 = arith.constant 0 : index
    %170 = vector.load %arg11[%c0_72, %c0_73] : memref<16x32xf32, #tpu.memory_space<vmem>>, vector<16x32xf32>
    %c0_74 = arith.constant 0 : index
    %c0_75 = arith.constant 0 : index
    %171 = vector.load %arg5[%c0_74, %c0_75] : memref<1x32xf32, #tpu.memory_space<vmem>>, vector<1x32xf32>
    %172 = vector.broadcast %171 : vector<1x32xf32> to vector<16x32xf32>
    %173 = arith.addf %170, %172 : vector<16x32xf32>
    %174 = arith.addf %0, %173 : vector<16x32xf32>
    %c0_76 = arith.constant 0 : index
    %c0_77 = arith.constant 0 : index
    %175 = vector.load %arg6[%c0_76, %c0_77] : memref<32x16xf32, #tpu.memory_space<vmem>>, vector<32x16xf32>
    %cst_78 = arith.constant dense<0.000000e+00> : vector<16x16xf32>
    %176 = tpu.matmul %174, %175, %cst_78 {dimension_numbers = #tpu.dot_dimension_numbers<[1], [0], [0], [1], [0, 0, 1, 1], [], []>} : vector<16x32xf32>, vector<32x16xf32>, vector<16x16xf32> -> vector<16x16xf32>
    %c0_79 = arith.constant 0 : index
    %c0_80 = arith.constant 0 : index
    %177 = vector.load %arg7[%c0_79, %c0_80] : memref<1x16xf32, #tpu.memory_space<vmem>>, vector<1x16xf32>
    %178 = vector.broadcast %177 : vector<1x16xf32> to vector<16x16xf32>
    %179 = arith.addf %176, %178 : vector<16x16xf32>
    %c0_81 = arith.constant 0 : index
    %c0_82 = arith.constant 0 : index
    %180 = vector.load %arg8[%c0_81, %c0_82] : memref<16x32xf32, #tpu.memory_space<vmem>>, vector<16x32xf32>
    %cst_83 = arith.constant dense<0.000000e+00> : vector<16x32xf32>
    %181 = tpu.matmul %179, %180, %cst_83 {dimension_numbers = #tpu.dot_dimension_numbers<[1], [0], [0], [1], [0, 0, 1, 1], [], []>} : vector<16x16xf32>, vector<16x32xf32>, vector<16x32xf32> -> vector<16x32xf32>
    %c0_84 = arith.constant 0 : index
    %c0_85 = arith.constant 0 : index
    %182 = vector.load %arg9[%c0_84, %c0_85] : memref<1x32xf32, #tpu.memory_space<vmem>>, vector<1x32xf32>
    %183 = vector.broadcast %182 : vector<1x32xf32> to vector<16x32xf32>
    %184 = arith.addf %181, %183 : vector<16x32xf32>
    %185 = arith.addf %174, %184 : vector<16x32xf32>
    %c0_86 = arith.constant 0 : index
    %c0_87 = arith.constant 0 : index
    %186 = vector.load %arg10[%c0_86, %c0_87] : memref<16x32xf32, #tpu.memory_space<vmem>>, vector<16x32xf32>
    tpu.vector_store %arg10[%c0_86, %c0_87], %185 {strides = array<i32>} : memref<16x32xf32, #tpu.memory_space<vmem>>, vector<16x32xf32>,
    return
  }
  func.func @transform_0(%arg0: i32) -> (i32, i32) {
    %c0_i32 = arith.constant 0 : i32
    %c0_i32_0 = arith.constant 0 : i32
    return %arg0, %c0_i32 : i32, i32
  }
  func.func @transform_1(%arg0: i32) -> (i32, i32) {
    %c0_i32 = arith.constant 0 : i32
    %c0_i32_0 = arith.constant 0 : i32
    %c0_i32_1 = arith.constant 0 : i32
    return %c0_i32, %c0_i32_0 : i32, i32
  }
  func.func @transform_2(%arg0: i32) -> (i32, i32) {
    %c0_i32 = arith.constant 0 : i32
    %c0_i32_0 = arith.constant 0 : i32
    %c0_i32_1 = arith.constant 0 : i32
    return %c0_i32, %c0_i32_0 : i32, i32
  }
  func.func @transform_3(%arg0: i32) -> (i32, i32) {
    %c0_i32 = arith.constant 0 : i32
    %c0_i32_0 = arith.constant 0 : i32
    %c0_i32_1 = arith.constant 0 : i32
    return %c0_i32, %c0_i32_0 : i32, i32
  }
  func.func @transform_4(%arg0: i32) -> (i32, i32) {
    %c0_i32 = arith.constant 0 : i32
    %c0_i32_0 = arith.constant 0 : i32
    %c0_i32_1 = arith.constant 0 : i32
    return %c0_i32, %c0_i32_0 : i32, i32
  }
  func.func @transform_5(%arg0: i32) -> (i32, i32) {
    %c0_i32 = arith.constant 0 : i32
    %c0_i32_0 = arith.constant 0 : i32
    %c0_i32_1 = arith.constant 0 : i32
    return %c0_i32, %c0_i32_0 : i32, i32
  }
  func.func @transform_6(%arg0: i32) -> (i32, i32) {
    %c0_i32 = arith.constant 0 : i32
    %c0_i32_0 = arith.constant 0 : i32
    %c0_i32_1 = arith.constant 0 : i32
    return %c0_i32, %c0_i32_0 : i32, i32
  }
  func.func @transform_7(%arg0: i32) -> (i32, i32) {
    %c0_i32 = arith.constant 0 : i32
    %c0_i32_0 = arith.constant 0 : i32
    %c0_i32_1 = arith.constant 0 : i32
    return %c0_i32, %c0_i32_0 : i32, i32
  }
  func.func @transform_8(%arg0: i32) -> (i32, i32) {
    %c0_i32 = arith.constant 0 : i32
    %c0_i32_0 = arith.constant 0 : i32
    %c0_i32_1 = arith.constant 0 : i32
    return %c0_i32, %c0_i32_0 : i32, i32
  }
  func.func @transform_9(%arg0: i32) -> (i32, i32) {
    %c0_i32 = arith.constant 0 : i32
    %c0_i32_0 = arith.constant 0 : i32
    return %arg0, %c0_i32 : i32, i32
  }
}

</mosaic_0001>

<bundles_post_ra>
// kernel: tpu_custom_call.1
= control target key start
LH: loop header
LB: loop body
LE: loop exit
PB: predicated region body
PF: predicated region fallthrough
CT: control target
= control target key end

     0   :  { %14 = vsyncpa [#allocation4], 0  ;;  %s3069_s0 = inlined_call_operand.vmem [shape: f32[16,32], index: 0, kind: input, shape index: {}]   ;;  %s3070_s1 = inlined_call_operand.vmem [shape: f32[32,96], index: 1, kind: input, shape index: {}]   ;;  %s3071_s2 = inlined_call_operand.vmem [shape: f32[1,96], index: 2, kind: input, shape index: {}]   ;;  %s3072_s3 = inlined_call_operand.hbm [shape: f32[32,32], index: 3, kind: input, shape index: {}]   ;;  %s3073_s4 = inlined_call_operand.vmem [shape: f32[1,32], index: 4, kind: input, shape index: {}]   ;;  %s3074_s5 = inlined_call_operand.vmem [shape: f32[32,16], index: 5, kind: input, shape index: {}]   ;;  %s3075_s6 = inlined_call_operand.vmem [shape: f32[1,16], index: 6, kind: input, shape index: {}]   ;;  %s3076_s7 = inlined_call_operand.hbm [shape: f32[16,32], index: 7, kind: input, shape index: {}]   ;;  %s3077_s8 = inlined_call_operand.vmem [shape: f32[1,32], index: 8, kind: input, shape index: {}]   ;;  %s3078_s9 = inlined_call_operand.hbm [shape: f32[16,32], index: 9, kind: output, shape index: {}]  }
   0x1   :  { %15 = vsyncpa [#allocation7], 0 }
   0x2   :  { %16 = vsyncpa [#allocation5], 0  ;;  %s2708_s30 = smov [#allocation3]   ;;  %s2636_s13 = scalar_lea.hbm %s3072_s3, 512 }
   0x3   :  { %s28_s10 = sshll.u32 %s2708_s30, 4  ;;  %p2637_p0 = scmp.ne.s32.totalorder %s3072_s3, %s2636_s13  ;;  %s29_s10 = int_to_ptr.vmem [resolvable:$true] %s28_s10 }
   0x4   :  { %p2640_p1 = scmp.lt.u32.totalorder %s2636_s13, %s3072_s3 }
   0x6   :  { %p2642_p2 = pnand %p2640_p1, %p2637_p0 }
   0x8   :  { %2645 = shalt.err (!%p2642_p2)
}
   0x9   :  { %s2646_s18 = scalar_lea.vmem %s29_s10, 512  ;;  %p2651_p4 = scmp.lt.s32.totalorder %s29_s10, %s29_s10 }
   0xa   :  { %p2647_p3 = scmp.ne.s32.totalorder %s29_s10, %s2646_s18  ;;  %p2652_p5 = scmp.lt.s32.totalorder %s2646_s18, %s2646_s18 }
   0xc   :  { %p2653_p6 = por %p2652_p5, %p2651_p4 }
   0xe   :  { %p2654_p7 = pnand %p2653_p6, %p2647_p3 }
  0x10   :  { %2657 = shalt.err (!%p2654_p7)
}
  0x11   :  { %s2709_s19 = smov 128   ;;  %s2710_s20 = smov 8  }
  0x12   :  { %34 = dma.hbm_to_vmem [thread:$0]  %s3072_s3, 512, %s29_s10, [#allocation4], %s2709_s19, %s2709_s19, %s2710_s20  }
  0x13   :  { %s2711_s23 = smov [#allocation6]   ;;  %s2658_s27 = scalar_lea.hbm %s3076_s7, 256 }
  0x14   :  { %s46_s24 = sshll.u32 %s2711_s23, 4  ;;  %p2659_p8 = scmp.ne.s32.totalorder %s3076_s7, %s2658_s27  ;;  %s47_s24 = int_to_ptr.vmem [resolvable:$true] %s46_s24 }
  0x15   :  { %p2662_p9 = scmp.lt.u32.totalorder %s2658_s27, %s3076_s7 }
  0x17   :  { %p2664_p10 = pnand %p2662_p9, %p2659_p8 }
  0x19   :  { %2667 = shalt.err (!%p2664_p10)
}
  0x1a   :  { %s2668_s12 = scalar_lea.vmem %s47_s24, 256  ;;  %p2673_p12 = scmp.lt.s32.totalorder %s47_s24, %s47_s24 }
  0x1b   :  { %p2669_p11 = scmp.ne.s32.totalorder %s47_s24, %s2668_s12  ;;  %p2674_p13 = scmp.lt.s32.totalorder %s2668_s12, %s2668_s12 }
  0x1d   :  { %p2675_p0 = por %p2674_p13, %p2673_p12 }
  0x1f   :  { %p2676_p1 = pnand %p2675_p0, %p2669_p11 }
  0x21   :  { %2679 = shalt.err (!%p2676_p1)
}
  0x22   :  { %52 = dma.hbm_to_vmem [thread:$0]  %s3076_s7, 256, %s47_s24, [#allocation7], %s2709_s19, %s2709_s19, %s2710_s20  }
  0x23   :  { %2702 = dma.done.wait [#allocation4], 512  }
  0x24   :  { %2703 = vsyncadd [#allocation4], 4294966784 }
  0x25   :  { %2704 = dma.done.wait [#allocation7], 256  }
  0x26   :  { %2705 = vsyncadd [#allocation7], 4294967040  ;;  %vm74_vm0 = vcmask 261120   ;;  %v63_v0 = vld [vmem:[%s3070_s1] sm:$0xff]  ;;  %v64_v1 = vld [vmem:[%s3070_s1 + $0x8] sm:$0xff]  ;;  %v2712_v8 = vmov 0.0  }
  0x27   :  { %v65_v2 = vld [vmem:[%s3070_s1 + $0x10] sm:$0xff]  ;;  %v2554_v3 = vpack.c.bf16 %v64_v1, %v63_v0  ;;  %v66_v4 = vld [vmem:[%s3070_s1 + $0x18] sm:$0xff]  ;;  %v2821_v5 = vld [vmem:[%s3069_s0] sm:$0xff]  ;;  %2416 = vmatprep.subr.mxu1 %v2712_v8  ;;  %vm2713_vm1 = vmmov 0   ;;  %s2715_s27 = smov 96   ;;  %s2716_s28 = smov 88  }
  0x28   :  { %v2558_v6 = vpack.c.bf16 %v66_v4, %v65_v2  ;;  %2413 = vmatprep.mubr.msk.f32.mxu0 %vm74_vm0, %v2821_v5  ;;  %v2828_v7 = vld [vmem:[%s3069_s0 + $0x8] sm:$0xff]  ;;  %2418 = vmatprep.mubr.msk.f32.mxu1 %vm2713_vm1, %v2712_v8  ;;  %v2299_v9 = vld [vmem:[%s3071_s2] ss:$0 sm:$0xff]  ;;  %s2714_s0 = smov 120   ;;  %vm159_vm2 = vcmask 64512   ;;  %s2717_s2 = smov 56  }
  0x29   :  { %2555 = vmatprep.subr.bf16.mxu0 %v2554_v3  ;;  %s2718_s29 = smov 80   ;;  %s2719_s30 = smov 64   ;;  %v2887_v45 = vld [vmem:[#allocation3 + $0x8] sm:$0xff]  ;;  %v2891_v48 = vld [vmem:[#allocation3] sm:$0xff]  ;;  %v2918_v2 = vld [vmem:[#allocation3 + $0x10] sm:$0xff]  ;;  %vm2195_vm3 = vcmask 130048  }
  0x2a   :  { %2557 = vmatpush3.bf16.msra.mxu0 %v2554_v3  ;;  %s2720_s11 = smov 112   ;;  %s2721_s12 = smov 72  }
  0x2b   :  { %2559 = vmatprep.subr.bf16.mxu0 %v2558_v6  ;;  %s2722_s3 = smov 104   ;;  %s2723_s10 = smov 48  }
  0x2c   :  { %s2724_s13 = smov 40   ;;  %s2725_s26 = smov [#allocation8]  }
  0x2e   :  { %2561 = vmatpush3.bf16.msra.mxu0 %v2558_v6 }
  0x2f   :  { %2426 = vmatprep.subr.mxu0 %v2712_v8 }
  0x31   :  { %2414 = vmatmul.mubr.msk.f32.vlgmr.msra.gmra.mrb[0].mxu0 %vm74_vm0, %v2828_v7 }
  0x32   :  { %2428 = vmatprep.mubr.msk.f32.mxu0 %vm2713_vm1, %v2712_v8 }
 0x104   :  { %v2415_v10 = vpop.f32.mrb[0].mxu0 }
 0x105   :  { %v2841_v11 = vadd.f32 %v2415_v10, %v2299_v9  ;;  %v147_v12 = vpop.f32.mrb[1].mxu0 }
 0x106   :  { %v2843_v13 = vadd.f32 %v2299_v9, %v147_v12 }
 0x108   :  { %323 = vrot.lane.b32.xlu1 %v2843_v13, %s2714_s0  ;;  %157 = vrot.lane.b32.xlu0 %v2843_v13, %s2715_s27 }
 0x10c   :  { %325 = vrot.lane.b32.xlu0 %v2843_v13, %s2716_s28 }
 0x17a   :  { %v158_v14 = vpop.permute.xlu0 %157  ;;  %v324_v16 = vpop.permute.xlu1 %323 }
 0x17b   :  { %2417 = vmatpush3.xpose.msk.msra.mxu1 %vm159_vm2, %v158_v14 }
 0x17c   :  { %2421 = vmatprep.subr.mxu1 %v2712_v8 }
 0x17e   :  { %2419 = vmatmul.mubr.msk.f32.vlgmr.msra.gmra.mrb[0].mxu1 %vm159_vm2, %v2843_v13  ;;  %v326_v15 = vpop.permute.xlu0 %325 }
 0x17f   :  { %2427 = vmatpush3.xpose.msk.msra.mxu0 %vm159_vm2, %v326_v15  ;;  %2423 = vmatprep.mubr.msk.f32.mxu1 %vm2713_vm1, %v2712_v8 }
 0x180   :  { %2436 = vmatprep.subr.mxu0 %v2712_v8 }
 0x182   :  { %2429 = vmatmul.mubr.msk.f32.vlgmr.msra.gmra.mrb[2].mxu0 %vm159_vm2, %v324_v16 }
 0x183   :  { %2438 = vmatprep.mubr.msk.f32.mxu0 %vm2713_vm1, %v2712_v8  ;;  %2437 = vmatpush3.msra.mxu0 %v2887_v45 }
 0x184   :  { %2441 = vmatprep.subr.mxu0 %v2712_v8 }
 0x251   :  { %v230_v17 = vpop.f32.mrb[0].mxu1 }
 0x252   :  { %v234_v18 = vmul.f32 0.35355338, %v230_v17  ;;  %v2420_v19 = vpop.f32.mrb[1].mxu1 }
 0x254   :  { %v235_v20 = vsel %vm159_vm2, %v234_v18, -inf }
 0x255   :  { %236 = vmax.xlane.f32.xlu1 %v235_v20  ;;  %v397_v21 = vpop.f32.mrb[2].mxu0 }
 0x256   :  { %v401_v22 = vmul.f32 0.35355338, %v397_v21  ;;  %v2430_v23 = vpop.f32.mrb[3].mxu0 }
 0x257   :  { %v2942_v23 = vld [vmem:[#allocation3 + $0x18] sm:$0xff] }
 0x258   :  { %v402_v24 = vsel %vm159_vm2, %v401_v22, -inf }
 0x259   :  { %403 = vmax.xlane.f32.xlu0 %v402_v24 }
 0x266   :  { %413 = vrot.lane.b32.xlu1 %v2843_v13, %s2717_s2 }
 0x2e2   :  { %v237_v25 = vpop.xlane.xlu1 %236 }
 0x2e3   :  { %v238_v26 = vsub.f32 %v234_v18, %v237_v25 }
 0x2e5   :  { %v239_v27 = vmul.f32 1.442695, %v238_v26 }
 0x2e6   :  { %v404_v28 = vpop.xlane.xlu0 %403  ;;  %v414_v35 = vpop.permute.xlu1 %413 }
 0x2e7   :  { %2604 = vpow2.f32 %v239_v27  ;;  %v405_v29 = vsub.f32 %v401_v22, %v404_v28 }
 0x2e9   :  { %v406_v30 = vmul.f32 1.442695, %v405_v29 }
 0x2eb   :  { %2606 = vpow2.f32 %v406_v30 }
 0x2f1   :  { %v2605_v31 = vpop.eup %2604 }
 0x2f2   :  { %v241_v32 = vsel %vm159_vm2, %v2605_v31, 0.0 }
 0x2f3   :  { %242 = vadd.xlane.f32.xlu0 %v241_v32 }
 0x2f5   :  { %v2607_v33 = vpop.eup %2606 }
 0x2f6   :  { %v408_v34 = vsel %vm159_vm2, %v2607_v33, 0.0 }
 0x2f7   :  { %409 = vadd.xlane.f32.xlu1 %v408_v34 }
 0x308   :  { %638 = vrot.lane.b32.xlu1 %v2843_v13, %s2718_s29 }
 0x309   :  { %246 = vrot.lane.b32.xlu0 %v2843_v13, %s2719_s30 }
 0x30d   :  { %636 = vrot.lane.b32.xlu0 %v2843_v13, %s2720_s11 }
 0x380   :  { %v243_v36 = vpop.xlane.xlu0 %242 }
 0x381   :  { %2608 = vrcp.f32 %v243_v36 }
 0x384   :  { %v410_v37 = vpop.xlane.xlu1 %409  ;;  %v247_v38 = vpop.permute.xlu0 %246 }
 0x385   :  { %2610 = vrcp.f32 %v410_v37  ;;  %2422 = vmatpush3.msra.mxu1 %v247_v38 }
 0x386   :  { %2431 = vmatprep.subr.mxu1 %v2712_v8 }
 0x388   :  { %v639_v43 = vpop.permute.xlu1 %638  ;;  %v637_v44 = vpop.permute.xlu0 %636 }
 0x38b   :  { %v2609_v39 = vpop.eup %2608 }
 0x38c   :  { %v245_v40 = vmul.f32 %v2609_v39, %v2605_v31 }
 0x38e   :  { %2424 = vmatmul.mubr.msk.f32.vlgmr.msra.gmra.mrb[2].mxu1 %vm159_vm2, %v245_v40 }
 0x38f   :  { %v2611_v41 = vpop.eup %2610  ;;  %2432 = vmatpush3.msra.mxu1 %v414_v35  ;;  %2433 = vmatprep.mubr.msk.f32.mxu1 %vm2713_vm1, %v2712_v8 }
 0x390   :  { %v412_v42 = vmul.f32 %v2611_v41, %v2607_v33  ;;  %2446 = vmatprep.subr.mxu1 %v2712_v8 }
 0x392   :  { %2434 = vmatmul.mubr.msk.f32.vlgmr.msra.gmra.mrb[4].mxu1 %vm159_vm2, %v412_v42 }
 0x393   :  { %2448 = vmatprep.mubr.msk.f32.mxu1 %vm2713_vm1, %v2712_v8 }
 0x396   :  { %2447 = vmatpush3.xpose.msk.msra.mxu1 %vm159_vm2, %v639_v43 }
 0x397   :  { %2451 = vmatprep.subr.mxu1 %v2712_v8 }
 0x399   :  { %2449 = vmatmul.mubr.msk.f32.vlgmr.msra.gmra.mrb[6].mxu1 %vm159_vm2, %v637_v44 }
 0x39a   :  { %2453 = vmatprep.mubr.msk.f32.mxu1 %vm2713_vm1, %v2712_v8 }
 0x461   :  { %v318_v46 = vpop.f32.mrb[2].mxu1 }
 0x462   :  { %v2425_v47 = vpop.f32.mrb[3].mxu1 }
 0x465   :  { %v485_v49 = vpop.f32.mrb[4].mxu1 }
 0x466   :  { %v2435_v50 = vpop.f32.mrb[5].mxu1  ;;  %2439 = vmatmul.mubr.msk.f32.vlgmr.msra.gmra.mrb[4].mxu0 %vm159_vm2, %v485_v49 }
 0x467   :  { %2442 = vmatpush3.msra.mxu0 %v2891_v48  ;;  %2443 = vmatprep.mubr.msk.f32.mxu0 %vm2713_vm1, %v2712_v8 }
 0x468   :  { %2456 = vmatprep.subr.mxu0 %v2712_v8 }
 0x46c   :  { %v710_v51 = vpop.f32.mrb[6].mxu1 }
 0x46d   :  { %v714_v52 = vmul.f32 0.35355338, %v710_v51  ;;  %v2450_v53 = vpop.f32.mrb[7].mxu1 }
 0x46e   :  { %2444 = vmatmul.mubr.msk.f32.vlgmr.msra.gmra.mrb[4].mxu0 %vm159_vm2, %v318_v46 }
 0x46f   :  { %v715_v54 = vsel %vm159_vm2, %v714_v52, -inf  ;;  %2458 = vmatprep.mubr.msk.f32.mxu0 %vm2713_vm1, %v2712_v8  ;;  %2457 = vmatpush3.msra.mxu0 %v2918_v2 }
 0x470   :  { %716 = vmax.xlane.f32.xlu1 %v715_v54  ;;  %2466 = vmatprep.subr.mxu0 %v2712_v8 }
 0x481   :  { %879 = vrot.lane.b32.xlu1 %v2843_v13, %s2721_s12 }
 0x485   :  { %877 = vrot.lane.b32.xlu1 %v2843_v13, %s2722_s3 }
 0x4fd   :  { %v717_v55 = vpop.xlane.xlu1 %716 }
 0x4fe   :  { %v718_v56 = vsub.f32 %v714_v52, %v717_v55 }
 0x500   :  { %v719_v57 = vmul.f32 1.442695, %v718_v56 }
 0x501   :  { %v880_v63 = vpop.permute.xlu1 %879 }
 0x502   :  { %2612 = vpow2.f32 %v719_v57 }
 0x505   :  { %v878_v1 = vpop.permute.xlu1 %877 }
 0x50c   :  { %v2613_v58 = vpop.eup %2612 }
 0x50d   :  { %v721_v59 = vsel %vm159_vm2, %v2613_v58, 0.0 }
 0x50e   :  { %722 = vadd.xlane.f32.xlu0 %v721_v59 }
 0x524   :  { %726 = vrot.lane.b32.xlu0 %v2843_v13, %s2723_s10 }
 0x59b   :  { %v723_v60 = vpop.xlane.xlu0 %722 }
 0x59c   :  { %2614 = vrcp.f32 %v723_v60 }
 0x59f   :  { %v727_v61 = vpop.permute.xlu0 %726 }
 0x5a0   :  { %2452 = vmatpush3.msra.mxu1 %v727_v61 }
 0x5a1   :  { %2461 = vmatprep.subr.mxu1 %v2712_v8 }
 0x5a6   :  { %v2615_v62 = vpop.eup %2614 }
 0x5a7   :  { %v725_v0 = vmul.f32 %v2615_v62, %v2613_v58 }
 0x5a9   :  { %2454 = vmatmul.mubr.msk.f32.vlgmr.msra.gmra.mrb[8].mxu1 %vm159_vm2, %v725_v0 }
 0x5aa   :  { %2462 = vmatpush3.xpose.msk.msra.mxu1 %vm159_vm2, %v880_v63  ;;  %2463 = vmatprep.mubr.msk.f32.mxu1 %vm2713_vm1, %v2712_v8 }
 0x5ab   :  { %2476 = vmatprep.subr.mxu1 %v2712_v8 }
 0x5ad   :  { %2464 = vmatmul.mubr.msk.f32.vlgmr.msra.gmra.mrb[10].mxu1 %vm159_vm2, %v878_v1 }
 0x5ae   :  { %2478 = vmatprep.mubr.msk.f32.mxu1 %vm2713_vm1, %v2712_v8 }
 0x67c   :  { %v798_v3 = vpop.f32.mrb[8].mxu1 }
 0x67d   :  { %v2455_v4 = vpop.f32.mrb[9].mxu1  ;;  %2459 = vmatmul.mubr.msk.f32.vlgmr.msra.gmra.mrb[4].mxu0 %vm159_vm2, %v798_v3 }
 0x67e   :  { %2468 = vmatprep.mubr.msk.f32.mxu0 %vm2713_vm1, %v2712_v8 }
 0x680   :  { %v951_v6 = vpop.f32.mrb[10].mxu1 }
 0x681   :  { %v955_v9 = vmul.f32 0.35355338, %v951_v6  ;;  %v2465_v10 = vpop.f32.mrb[11].mxu1 }
 0x683   :  { %v956_v12 = vsel %vm159_vm2, %v955_v9, -inf }
 0x684   :  { %957 = vmax.xlane.f32.xlu0 %v956_v12 }
 0x69a   :  { %967 = vrot.lane.b32.xlu0 %v2843_v13, %s2724_s13 }
 0x69e   :  { %1287 = vrot.lane.b32.xlu0 %v2841_v11, %s2716_s28 }
 0x711   :  { %v958_v14 = vpop.xlane.xlu0 %957 }
 0x712   :  { %v959_v15 = vsub.f32 %v955_v9, %v958_v14 }
 0x714   :  { %v960_v16 = vmul.f32 1.442695, %v959_v15  ;;  %v2334_v15 = vld [vmem:[%s3073_s4] ss:$0 sm:$0xff] }
 0x715   :  { %v968_v17 = vpop.permute.xlu0 %967 }
 0x716   :  { %2616 = vpow2.f32 %v960_v16  ;;  %2467 = vmatpush3.msra.mxu0 %v968_v17 }
 0x717   :  { %2471 = vmatprep.subr.mxu0 %v2712_v8 }
 0x719   :  { %v1288_v29 = vpop.permute.xlu0 %1287 }
 0x720   :  { %v2617_v18 = vpop.eup %2616 }
 0x721   :  { %v962_v19 = vsel %vm159_vm2, %v2617_v18, 0.0 }
 0x722   :  { %963 = vadd.xlane.f32.xlu1 %v962_v19 }
 0x733   :  { %1120 = vrot.lane.b32.xlu1 %v2841_v11, %s2715_s27 }
 0x737   :  { %1285 = vrot.lane.b32.xlu1 %v2841_v11, %s2714_s0  ;;  %s2286_s0 = sshll.u32 %s2725_s26, 4  ;;  %s2287_s0 = int_to_ptr.vmem [resolvable:$true] %s2286_s0 }
 0x738   :  { %p2685_p3 = scmp.lt.s32.totalorder %s2287_s0, %s2287_s0 }
 0x7af   :  { %v964_v13 = vpop.xlane.xlu1 %963 }
 0x7b0   :  { %2618 = vrcp.f32 %v964_v13 }
 0x7b3   :  { %v1121_v20 = vpop.permute.xlu1 %1120 }
 0x7b4   :  { %2477 = vmatpush3.xpose.msk.msra.mxu1 %vm159_vm2, %v1121_v20 }
 0x7b5   :  { %2481 = vmatprep.subr.mxu1 %v2712_v8 }
 0x7b7   :  { %2479 = vmatmul.mubr.msk.f32.vlgmr.msra.gmra.mrb[12].mxu1 %vm159_vm2, %v2841_v11  ;;  %v1286_v31 = vpop.permute.xlu1 %1285 }
 0x7b8   :  { %2483 = vmatprep.mubr.msk.f32.mxu1 %vm2713_vm1, %v2712_v8 }
 0x7ba   :  { %v2619_v21 = vpop.eup %2618 }
 0x7bb   :  { %v966_v22 = vmul.f32 %v2619_v21, %v2617_v18 }
 0x7bd   :  { %2469 = vmatmul.mubr.msk.f32.vlgmr.msra.gmra.mrb[6].mxu0 %vm159_vm2, %v966_v22 }
 0x7be   :  { %2472 = vmatpush3.msra.mxu0 %v2942_v23  ;;  %2473 = vmatprep.mubr.msk.f32.mxu0 %vm2713_vm1, %v2712_v8 }
 0x7bf   :  { %2486 = vmatprep.subr.mxu0 %v2712_v8 }
 0x88a   :  { %v1192_v24 = vpop.f32.mrb[12].mxu1 }
 0x88b   :  { %v1196_v25 = vmul.f32 0.35355338, %v1192_v24  ;;  %v2480_v26 = vpop.f32.mrb[13].mxu1 }
 0x88d   :  { %v1197_v27 = vsel %vm159_vm2, %v1196_v25, -inf }
 0x88e   :  { %1198 = vmax.xlane.f32.xlu0 %v1197_v27 }
 0x890   :  { %v1039_v28 = vpop.f32.mrb[6].mxu0 }
 0x891   :  { %v2470_v30 = vpop.f32.mrb[7].mxu0  ;;  %2474 = vmatmul.mubr.msk.f32.vlgmr.msra.gmra.mrb[4].mxu0 %vm159_vm2, %v1039_v28 }
 0x892   :  { %2487 = vmatpush3.xpose.msk.msra.mxu0 %vm159_vm2, %v1288_v29  ;;  %2488 = vmatprep.mubr.msk.f32.mxu0 %vm2713_vm1, %v2712_v8 }
 0x893   :  { %2496 = vmatprep.subr.mxu0 %v2712_v8 }
 0x895   :  { %2489 = vmatmul.mubr.msk.f32.vlgmr.msra.gmra.mrb[8].mxu0 %vm159_vm2, %v1286_v31 }
 0x896   :  { %2497 = vmatpush3.msra.mxu0 %v2887_v45  ;;  %2498 = vmatprep.mubr.msk.f32.mxu0 %vm2713_vm1, %v2712_v8 }
 0x897   :  { %2501 = vmatprep.subr.mxu0 %v2712_v8 }
 0x91b   :  { %v1199_v32 = vpop.xlane.xlu0 %1198 }
 0x91c   :  { %v1200_v33 = vsub.f32 %v1196_v25, %v1199_v32 }
 0x91e   :  { %v1201_v34 = vmul.f32 1.442695, %v1200_v33 }
 0x920   :  { %2620 = vpow2.f32 %v1201_v34 }
 0x92a   :  { %v2621_v35 = vpop.eup %2620 }
 0x92b   :  { %v1203_v36 = vsel %vm159_vm2, %v2621_v35, 0.0 }
 0x92c   :  { %1204 = vadd.xlane.f32.xlu0 %v1203_v36 }
 0x964   :  { %v1113_v37 = vpop.f32.mrb[4].mxu0 }
 0x965   :  { %1118 = vst.msk [vmem:[#allocation2] sm:$0xff] %vm74_vm0, %v1113_v37  ;;  %v2475_v38 = vpop.f32.mrb[5].mxu0 }
 0x966   :  { %v2095_v38 = vld [vmem:[%s3074_s5 + $0x8] sm:$0xff] }
 0x968   :  { %v1359_v39 = vpop.f32.mrb[8].mxu0 }
 0x969   :  { %v1363_v40 = vmul.f32 0.35355338, %v1359_v39  ;;  %v2490_v41 = vpop.f32.mrb[9].mxu0  ;;  %v2096_v39 = vld [vmem:[%s3074_s5 + $0x10] sm:$0xff] }
 0x96b   :  { %v1364_v42 = vsel %vm159_vm2, %v1363_v40, -inf }
 0x96c   :  { %1365 = vmax.xlane.f32.xlu1 %v1364_v42  ;;  %v2081_v14 = vld [vmem:[#allocation2] sm:$0xff] }
 0x96d   :  { %v2090_v18 = vadd.f32 %v2334_v15, %v2081_v14 }
 0x96f   :  { %v3012_v20 = vadd.f32 %v2090_v18, %v2821_v5 }
 0x97d   :  { %1208 = vrot.lane.b32.xlu1 %v2841_v11, %s2719_s30 }
 0x981   :  { %1600 = vrot.lane.b32.xlu1 %v2841_v11, %s2718_s29 }
 0x985   :  { %1598 = vrot.lane.b32.xlu1 %v2841_v11, %s2720_s11 }
 0x9b9   :  { %v1205_v43 = vpop.xlane.xlu0 %1204 }
 0x9ba   :  { %2622 = vrcp.f32 %v1205_v43 }
 0x9c4   :  { %v2623_v45 = vpop.eup %2622 }
 0x9c5   :  { %v1207_v49 = vmul.f32 %v2623_v45, %v2621_v35 }
 0x9f9   :  { %v1366_v44 = vpop.xlane.xlu1 %1365 }
 0x9fa   :  { %v1367_v46 = vsub.f32 %v1363_v40, %v1366_v44 }
 0x9fc   :  { %v1368_v47 = vmul.f32 1.442695, %v1367_v46  ;;  %v2186_v46 = vld [vmem:[#allocation6] sm:$0xff] }
 0x9fd   :  { %v1209_v50 = vpop.permute.xlu1 %1208 }
 0x9fe   :  { %2624 = vpow2.f32 %v1368_v47  ;;  %2482 = vmatpush3.msra.mxu1 %v1209_v50  ;;  %v2187_v47 = vld [vmem:[#allocation6 + $0x8] sm:$0xff]  ;;  %v2335_v50 = vld [vmem:[%s3075_s6] ss:$0 sm:$0xff]  ;;  %s2680_s6 = scalar_lea.vmem %s2287_s0, 256 }
 0x9ff   :  { %2484 = vmatmul.mubr.msk.f32.vlgmr.msra.gmra.mrb[14].mxu1 %vm159_vm2, %v1207_v49  ;;  %2491 = vmatprep.subr.mxu1 %v2712_v8  ;;  %v2570_v49 = vpack.c.bf16 %v2187_v47, %v2186_v46  ;;  %p2681_p2 = scmp.ne.s32.totalorder %s2287_s0, %s2680_s6  ;;  %p2686_p4 = scmp.lt.s32.totalorder %s2680_s6, %s2680_s6 }
 0xa00   :  { %2493 = vmatprep.mubr.msk.f32.mxu1 %vm2713_vm1, %v2712_v8 }
 0xa01   :  { %v1601_v56 = vpop.permute.xlu1 %1600  ;;  %p2687_p5 = por %p2686_p4, %p2685_p3 }
 0xa03   :  { %p2688_p6 = pnand %p2687_p5, %p2681_p2 }
 0xa05   :  { %v1599_v58 = vpop.permute.xlu1 %1598 }
 0xa08   :  { %v2625_v51 = vpop.eup %2624 }
 0xa09   :  { %v1370_v52 = vsel %vm159_vm2, %v2625_v51, 0.0 }
 0xa0a   :  { %1371 = vadd.xlane.f32.xlu0 %v1370_v52 }
 0xa20   :  { %1375 = vrot.lane.b32.xlu0 %v2841_v11, %s2717_s2 }
 0xa97   :  { %v1372_v53 = vpop.xlane.xlu0 %1371 }
 0xa98   :  { %2626 = vrcp.f32 %v1372_v53 }
 0xa9b   :  { %v1376_v54 = vpop.permute.xlu0 %1375 }
 0xa9c   :  { %2492 = vmatpush3.msra.mxu1 %v1376_v54 }
 0xa9d   :  { %2506 = vmatprep.subr.mxu1 %v2712_v8 }
 0xaa2   :  { %v2627_v55 = vpop.eup %2626 }
 0xaa3   :  { %v1374_v57 = vmul.f32 %v2627_v55, %v2625_v51 }
 0xaa5   :  { %2494 = vmatmul.mubr.msk.f32.vlgmr.msra.gmra.mrb[16].mxu1 %vm159_vm2, %v1374_v57 }
 0xaa6   :  { %2507 = vmatpush3.xpose.msk.msra.mxu1 %vm159_vm2, %v1601_v56  ;;  %2508 = vmatprep.mubr.msk.f32.mxu1 %vm2713_vm1, %v2712_v8 }
 0xaa7   :  { %2511 = vmatprep.subr.mxu1 %v2712_v8 }
 0xaa9   :  { %2509 = vmatmul.mubr.msk.f32.vlgmr.msra.gmra.mrb[18].mxu1 %vm159_vm2, %v1599_v58 }
 0xaaa   :  { %2513 = vmatprep.mubr.msk.f32.mxu1 %vm2713_vm1, %v2712_v8 }
 0xad2   :  { %v1280_v59 = vpop.f32.mrb[14].mxu1 }
 0xad3   :  { %v2485_v60 = vpop.f32.mrb[15].mxu1 }
 0xb78   :  { %v1447_v61 = vpop.f32.mrb[16].mxu1 }
 0xb79   :  { %v2495_v62 = vpop.f32.mrb[17].mxu1  ;;  %2499 = vmatmul.mubr.msk.f32.vlgmr.msra.gmra.mrb[10].mxu0 %vm159_vm2, %v1447_v61 }
 0xb7a   :  { %2502 = vmatpush3.msra.mxu0 %v2891_v48  ;;  %2503 = vmatprep.mubr.msk.f32.mxu0 %vm2713_vm1, %v2712_v8 }
 0xb7b   :  { %2516 = vmatprep.subr.mxu0 %v2712_v8 }
 0xb7c   :  { %v1672_v63 = vpop.f32.mrb[18].mxu1 }
 0xb7d   :  { %v1676_v0 = vmul.f32 0.35355338, %v1672_v63  ;;  %v2510_v1 = vpop.f32.mrb[19].mxu1 }
 0xb7f   :  { %v1677_v3 = vsel %vm159_vm2, %v1676_v0, -inf }
 0xb80   :  { %1678 = vmax.xlane.f32.xlu0 %v1677_v3 }
 0xb81   :  { %2504 = vmatmul.mubr.msk.f32.vlgmr.msra.gmra.mrb[10].mxu0 %vm159_vm2, %v1280_v59 }
 0xb82   :  { %2517 = vmatpush3.msra.mxu0 %v2918_v2  ;;  %2518 = vmatprep.mubr.msk.f32.mxu0 %vm2713_vm1, %v2712_v8 }
 0xb83   :  { %2526 = vmatprep.subr.mxu0 %v2712_v8 }
 0xb96   :  { %1688 = vrot.lane.b32.xlu0 %v2841_v11, %s2723_s10 }
 0xb9a   :  { %1839 = vrot.lane.b32.xlu0 %v2841_v11, %s2722_s3 }
 0xc0d   :  { %v1679_v48 = vpop.xlane.xlu0 %1678 }
 0xc0e   :  { %v1680_v4 = vsub.f32 %v1676_v0, %v1679_v48 }
 0xc10   :  { %v1681_v6 = vmul.f32 1.442695, %v1680_v4 }
 0xc11   :  { %v1689_v9 = vpop.permute.xlu0 %1688 }
 0xc12   :  { %2628 = vpow2.f32 %v1681_v6  ;;  %2512 = vmatpush3.msra.mxu1 %v1689_v9 }
 0xc13   :  { %2521 = vmatprep.subr.mxu1 %v2712_v8 }
 0xc15   :  { %v1840_v13 = vpop.permute.xlu0 %1839 }
 0xc1c   :  { %v2629_v2 = vpop.eup %2628 }
 0xc1d   :  { %v1683_v10 = vsel %vm159_vm2, %v2629_v2, 0.0 }
 0xc1e   :  { %1684 = vadd.xlane.f32.xlu1 %v1683_v10 }
 0xc2f   :  { %1841 = vrot.lane.b32.xlu1 %v2841_v11, %s2721_s12 }
 0xcab   :  { %v1685_v12 = vpop.xlane.xlu1 %1684 }
 0xcac   :  { %2630 = vrcp.f32 %v1685_v12 }
 0xcaf   :  { %v1842_v19 = vpop.permute.xlu1 %1841 }
 0xcb6   :  { %v2631_v16 = vpop.eup %2630 }
 0xcb7   :  { %v1687_v17 = vmul.f32 %v2631_v16, %v2629_v2 }
 0xcb9   :  { %2514 = vmatmul.mubr.msk.f32.vlgmr.msra.gmra.mrb[20].mxu1 %vm159_vm2, %v1687_v17 }
 0xcba   :  { %2522 = vmatpush3.xpose.msk.msra.mxu1 %vm159_vm2, %v1842_v19  ;;  %2523 = vmatprep.mubr.msk.f32.mxu1 %vm2713_vm1, %v2712_v8 }
 0xcbd   :  { %2524 = vmatmul.mubr.msk.f32.vlgmr.msra.gmra.mrb[22].mxu1 %vm159_vm2, %v1840_v13 }
 0xcbe   :  { %2544 = vmatprep.mubr.msk.f32.mxu1 %vm74_vm0, %v3012_v20 }
 0xd8c   :  { %v1760_v21 = vpop.f32.mrb[20].mxu1 }
 0xd8d   :  { %v2515_v22 = vpop.f32.mrb[21].mxu1  ;;  %2519 = vmatmul.mubr.msk.f32.vlgmr.msra.gmra.mrb[10].mxu0 %vm159_vm2, %v1760_v21 }
 0xd8e   :  { %2528 = vmatprep.mubr.msk.f32.mxu0 %vm2713_vm1, %v2712_v8 }
 0xd90   :  { %v1913_v24 = vpop.f32.mrb[22].mxu1 }
 0xd91   :  { %v1917_v25 = vmul.f32 0.35355338, %v1913_v24  ;;  %v2525_v26 = vpop.f32.mrb[23].mxu1 }
 0xd93   :  { %v1918_v27 = vsel %vm159_vm2, %v1917_v25, -inf }
 0xd94   :  { %1919 = vmax.xlane.f32.xlu1 %v1918_v27 }
 0xe21   :  { %v1920_v5 = vpop.xlane.xlu1 %1919 }
 0xe22   :  { %v1921_v28 = vsub.f32 %v1917_v25, %v1920_v5 }
 0xe24   :  { %v1922_v29 = vmul.f32 1.442695, %v1921_v28 }
 0xe26   :  { %2632 = vpow2.f32 %v1922_v29 }
 0xe30   :  { %v2633_v30 = vpop.eup %2632 }
 0xe31   :  { %v1924_v31 = vsel %vm159_vm2, %v2633_v30, 0.0 }
 0xe32   :  { %1925 = vadd.xlane.f32.xlu0 %v1924_v31 }
 0xe48   :  { %1929 = vrot.lane.b32.xlu0 %v2841_v11, %s2724_s13  ;;  %v2094_v11 = vld [vmem:[%s3074_s5] sm:$0xff] }
 0xebf   :  { %v1926_v32 = vpop.xlane.xlu0 %1925 }
 0xec0   :  { %2634 = vrcp.f32 %v1926_v32 }
 0xec3   :  { %v1930_v33 = vpop.permute.xlu0 %1929 }
 0xec4   :  { %2527 = vmatpush3.msra.mxu0 %v1930_v33 }
 0xec5   :  { %2531 = vmatprep.subr.mxu0 %v2712_v8 }
 0xeca   :  { %v2635_v34 = vpop.eup %2634 }
 0xecb   :  { %v1928_v35 = vmul.f32 %v2635_v34, %v2633_v30 }
 0xecd   :  { %2529 = vmatmul.mubr.msk.f32.vlgmr.msra.gmra.mrb[12].mxu0 %vm159_vm2, %v1928_v35 }
 0xece   :  { %2532 = vmatpush3.msra.mxu0 %v2942_v23  ;;  %2533 = vmatprep.mubr.msk.f32.mxu0 %vm2713_vm1, %v2712_v8  ;;  %v2562_v23 = vpack.c.bf16 %v2095_v38, %v2094_v11  ;;  %v2097_v8 = vld [vmem:[%s3074_s5 + $0x18] sm:$0xff] }
 0xecf   :  { %v2566_v40 = vpack.c.bf16 %v2097_v8, %v2096_v39  ;;  %2571 = vmatprep.subr.bf16.mxu0 %v2570_v49 }
 0xed0   :  { %2563 = vmatprep.subr.bf16.mxu1 %v2562_v23 }
 0xed1   :  { %2565 = vmatpush3.bf16.msra.mxu1 %v2562_v23 }
 0xed2   :  { %2567 = vmatprep.subr.bf16.mxu1 %v2566_v40 }
 0xed5   :  { %2569 = vmatpush3.bf16.msra.mxu1 %v2566_v40 }
 0xfa0   :  { %v2001_v36 = vpop.f32.mrb[12].mxu0 }
 0xfa1   :  { %v2530_v37 = vpop.f32.mrb[13].mxu0  ;;  %2534 = vmatmul.mubr.msk.f32.vlgmr.msra.gmra.mrb[10].mxu0 %vm159_vm2, %v2001_v36 }
 0xfa2   :  { %2573 = vmatpush3.bf16.msra.mxu0 %v2570_v49 }
0x1074   :  { %v2075_v41 = vpop.f32.mrb[10].mxu0 }
0x1075   :  { %2080 = vst.msk [vmem:[#allocation2 + $0x8] sm:$0xff] %vm74_vm0, %v2075_v41  ;;  %v2535_v42 = vpop.f32.mrb[11].mxu0 }
0x107c   :  { %v2082_v43 = vld [vmem:[#allocation2 + $0x8] sm:$0xff] }
0x107d   :  { %v2091_v44 = vadd.f32 %v2334_v15, %v2082_v43 }
0x107f   :  { %v2093_v45 = vadd.f32 %v2091_v44, %v2828_v7  ;;  %v2338_v7 = vld [vmem:[%s3077_s8] ss:$0 sm:$0xff] }
0x1081   :  { %2545 = vmatmul.mubr.msk.f32.vlgmr.msra.gmra.mrb[24].mxu1 %vm74_vm0, %v2093_v45 }
0x1154   :  { %v2546_v51 = vpop.f32.mrb[24].mxu1 }
0x1155   :  { %v2177_v52 = vpop.f32.mrb[25].mxu1  ;;  %v2183_v54 = vadd.f32 %v2546_v51, %v2335_v50 }
0x1156   :  { %v2178_v53 = vadd.f32 %v2335_v50, %v2177_v52 }
0x1158   :  { %2551 = vmatprep.mubr.msk.f32.mxu0 %vm2195_vm3, %v2178_v53 }
0x1159   :  { %2552 = vmatmul.mubr.msk.f32.vlgmr.msra.gmra.mrb[14].mxu0 %vm2195_vm3, %v2183_v54 }
0x122c   :  { %v2553_v55 = vpop.f32.mrb[14].mxu0 }
0x122d   :  { %v2274_v56 = vadd.f32 %v2553_v55, %v2338_v7  ;;  %v2268_v57 = vpop.f32.mrb[15].mxu0 }
0x122e   :  { %v2269_v58 = vadd.f32 %v2338_v7, %v2268_v57 }
0x122f   :  { %v2278_v59 = vadd.f32 %v2274_v56, %v2093_v45 }
0x1230   :  { %v2277_v60 = vadd.f32 %v2269_v58, %v3012_v20 }
0x1231   :  { %2280 = vst.msk [vmem:[#allocation8 + $0x8] sm:$0xff] %vm74_vm0, %v2278_v59 }
0x1232   :  { %2279 = vst.msk [vmem:[#allocation8] sm:$0xff] %vm74_vm0, %v2277_v60 }
0x1233   :  { %2691 = shalt.err (!%p2688_p6)
}
0x1234   :  { %s2692_s28 = scalar_lea.hbm %s3078_s9, 256 }
0x1235   :  { %p2693_p7 = scmp.ne.s32.totalorder %s3078_s9, %s2692_s28  ;;  %p2696_p8 = scmp.lt.u32.totalorder %s2692_s28, %s3078_s9 }
0x1237   :  { %p2698_p9 = pnand %p2696_p8, %p2693_p7 }
0x1239   :  { %2701 = shalt.err (!%p2698_p9)
}
0x123a   :  { %2292 = dma.vmem_to_hbm [thread:$0]  %s2287_s0, 256, %s3078_s9, [#allocation5], %s2709_s19, %s2709_s19, %s2710_s20  }
0x123b   :  { %2706 = dma.done.wait [#allocation5], 256  }
0x123c   :  { %2707 = vsyncadd [#allocation5], 4294967040 }
0x123d   :  { %2296 = vsyncpa [#allocation4], 1 }
0x123e   :  { %2297 = vsyncpa [#allocation7], 1 }
0x123f   :  { %2298 = vsyncpa [#allocation5], 1 }

</bundles_post_ra>
